<compile_context>
chip_gen: v7x
topology: tpu7x:2x2x1
jax: 0.10.0
libtpu: 0.0.40
codegen_flags: <defaults>
</compile_context>

<pallas_src>
from functools import partial

import jax
import jax.numpy as jnp
from jax.experimental import pallas as pl
from jax.experimental.pallas import tpu as pltpu


def _conv_bn_relu_kernel(x2d_ref, w_ref, gamma_ref, beta_ref, o_ref, *, rows, eps):
    # x2d_ref : (rows, K)    bf16 im2col patch slab   (rows = N*Ho*Wo, K = KH*KW*Cin)
    # w_ref   : (K, Cpad)    bf16 weights, out-channels zero-padded to 128 lanes
    # gamma_ref, beta_ref : (1, Cpad) f32
    # o_ref   : (rows, Cpad) f32 lane-dense output
    acc = jnp.dot(x2d_ref[...], w_ref[...],
                  preferred_element_type=jnp.float32)          # one MXU matmul, f32 acc

    # BatchNorm2d training-mode batch statistics (biased var), single pass over acc.
    inv_n = jnp.float32(1.0 / rows)
    mean = jnp.sum(acc, axis=0, keepdims=True) * inv_n          # (1, Cpad)
    ex2 = jnp.sum(acc * acc, axis=0, keepdims=True) * inv_n     # (1, Cpad)
    var = jnp.maximum(ex2 - mean * mean, 0.0)
    inv_std = jax.lax.rsqrt(var + jnp.float32(eps))
    scale = gamma_ref[...] * inv_std                            # (1, Cpad)
    shift = beta_ref[...] - mean * scale                        # (1, Cpad)
    o_ref[...] = jnp.maximum(acc * scale + shift, 0.0).astype(o_ref.dtype)


def norm_simple_block(x_nchw, weight_oihw, gamma, beta, *, padding, eps=1e-5):
    """Forward pass of NormSimpleBlock. Input/output are NCHW like PyTorch."""
    N, Cin, H, W = x_nchw.shape
    Cout, Cin_w, KH, KW = weight_oihw.shape
    assert Cin == Cin_w

    Hp, Wp = H + 2 * padding, W + 2 * padding
    Ho, Wo = Hp - KH + 1, Wp - KW + 1                 # stride-1 conv output size
    rows = N * Ho * Wo
    K = KH * KW * Cin
    Cpad = ((Cout + 127) // 128) * 128                # lane-dense channel axis

    # --- glue (cheap XLA ops outside the kernel) -------------------------------
    x_nhwc = jnp.transpose(x_nchw, (0, 2, 3, 1))
    xp = jnp.pad(x_nhwc, ((0, 0), (padding, padding), (padding, padding), (0, 0)))

    # im2col: (rows, KH*KW*Cin), feature index = (kh*KW + kw)*Cin + ci
    taps = [jax.lax.slice(xp, (0, kh, kw, 0), (N, kh + Ho, kw + Wo, Cin))
            for kh in range(KH) for kw in range(KW)]
    x2d = jnp.concatenate(taps, axis=-1).reshape(rows, K).astype(jnp.bfloat16)

    # weight (O,I,KH,KW) -> (KH*KW*Cin, Cout), matching im2col feature order,
    # then zero-pad the out-channel axis to Cpad lanes.
    w2d = jnp.transpose(weight_oihw, (2, 3, 1, 0)).reshape(K, Cout)
    w2d = jnp.pad(w2d, ((0, 0), (0, Cpad - Cout))).astype(jnp.bfloat16)
    gamma_p = jnp.pad(gamma.astype(jnp.float32), (0, Cpad - Cout)).reshape(1, Cpad)
    beta_p = jnp.pad(beta.astype(jnp.float32), (0, Cpad - Cout)).reshape(1, Cpad)

    kernel = partial(_conv_bn_relu_kernel, rows=rows, eps=float(eps))

    out2d = pl.pallas_call(
        kernel,
        out_shape=jax.ShapeDtypeStruct((rows, Cpad), jnp.float32),
        grid=(1,),
        in_specs=[
            pl.BlockSpec((rows, K), lambda i: (0, 0)),
            pl.BlockSpec((K, Cpad), lambda i: (0, 0)),
            pl.BlockSpec((1, Cpad), lambda i: (0, 0)),
            pl.BlockSpec((1, Cpad), lambda i: (0, 0)),
        ],
        out_specs=pl.BlockSpec((rows, Cpad), lambda i: (0, 0)),
        compiler_params=pltpu.CompilerParams(dimension_semantics=("arbitrary",)),
    )(x2d, w2d, gamma_p, beta_p)

    out = out2d[:, :Cout].reshape(N, Ho, Wo, Cout)          # drop channel padding
    return jnp.transpose(out, (0, 3, 1, 2)).astype(x_nchw.dtype)   # back to NCHW


def _reference(x_nchw, weight_oihw, gamma, beta, *, padding, eps=1e-5):
    """Pure-JAX f32 reference (conv -> training-mode BN -> relu)."""
    y = jax.lax.conv_general_dilated(
        x_nchw.astype(jnp.float32), weight_oihw.astype(jnp.float32),
        window_strides=(1, 1), padding=[(padding, padding), (padding, padding)],
        dimension_numbers=("NCHW", "OIHW", "NCHW"),
        precision=jax.lax.Precision.HIGHEST,
    )
    mean = jnp.mean(y, axis=(0, 2, 3), keepdims=True)
    var = jnp.mean((y - mean) ** 2, axis=(0, 2, 3), keepdims=True)
    y = (y - mean) * jax.lax.rsqrt(var + eps)
    y = y * gamma.reshape(1, -1, 1, 1) + beta.reshape(1, -1, 1, 1)
    return jnp.maximum(y, 0.0)


if __name__ == "__main__":
    # NormSimpleBlock(in_channels=4, out_channels=8, kernel_size=3, padding=1)
    N, Cin, Cout, H, W, Ksz, PAD = 2, 4, 8, 16, 16, 3, 1

    key = jax.random.PRNGKey(0)
    kx, kw = jax.random.split(key)
    x = jax.random.normal(kx, (N, Cin, H, W), dtype=jnp.float32)
    weight = 0.1 * jax.random.normal(kw, (Cout, Cin, Ksz, Ksz), dtype=jnp.float32)
    gamma = jnp.ones((Cout,), dtype=jnp.float32)   # BatchNorm2d default affine
    beta = jnp.zeros((Cout,), dtype=jnp.float32)

    out = norm_simple_block(x, weight, gamma, beta, padding=PAD)
    out = jax.block_until_ready(out)

    ref = _reference(x, weight, gamma, beta, padding=PAD)
    err = float(jnp.max(jnp.abs(out - ref)))
    assert out.shape == (N, Cout, H, W), out.shape
    # bf16 MXU inputs (f32 accumulate) vs. full-f32 reference -> ~1e-2 worst case.
    assert err < 3e-2, f"max abs error {err}"

    print("KERNEL_OK")
</pallas_src>

<mosaic_0001>
module attributes {stable_mosaic.version = 11 : i64} {
  func.func @_conv_bn_relu_kernel(%arg0: i32, %arg1: memref<512x36xbf16, #tpu.memory_space<vmem>>, %arg2: memref<36x128xbf16, #tpu.memory_space<vmem>>, %arg3: memref<1x128xf32, #tpu.memory_space<vmem>>, %arg4: memref<1x128xf32, #tpu.memory_space<vmem>>, %arg5: memref<512x128xf32, #tpu.memory_space<vmem>>) attributes {dimension_semantics = [#tpu.dimension_semantics<arbitrary>], iteration_bounds = array<i64: 1>, scalar_prefetch = 0 : i64, scratch_operands = 0 : i64, tpu.core_type = #tpu.core_type<tc>, window_params = [{pipeline_mode = #tpu.pipeline_mode<synchronous>, transform_indices = @transform_0, window_bounds = array<i64: 512, 36>}, {pipeline_mode = #tpu.pipeline_mode<synchronous>, transform_indices = @transform_1, window_bounds = array<i64: 36, 128>}, {pipeline_mode = #tpu.pipeline_mode<synchronous>, transform_indices = @transform_2, window_bounds = array<i64: 1, 128>}, {pipeline_mode = #tpu.pipeline_mode<synchronous>, transform_indices = @transform_3, window_bounds = array<i64: 1, 128>}, {pipeline_mode = #tpu.pipeline_mode<synchronous>, transform_indices = @transform_4, window_bounds = array<i64: 512, 128>}]} {
    %c0 = arith.constant 0 : index
    %c0_0 = arith.constant 0 : index
    %0 = vector.load %arg1[%c0, %c0_0] : memref<512x36xbf16, #tpu.memory_space<vmem>>, vector<512x36xbf16>
    %c0_1 = arith.constant 0 : index
    %c0_2 = arith.constant 0 : index
    %1 = vector.load %arg2[%c0_1, %c0_2] : memref<36x128xbf16, #tpu.memory_space<vmem>>, vector<36x128xbf16>
    %cst = arith.constant dense<0.000000e+00> : vector<512x128xf32>
    %2 = tpu.matmul %0, %1, %cst {dimension_numbers = #tpu.dot_dimension_numbers<[1], [0], [0], [1], [0, 0, 1, 1], [], []>} : vector<512x36xbf16>, vector<36x128xbf16>, vector<512x128xf32> -> vector<512x128xf32>
    %cst_3 = arith.constant dense<0.000000e+00> : vector<128xf32>
    %3 = vector.multi_reduction <add>, %2, %cst_3 [0] : vector<512x128xf32> to vector<128xf32>
    %4 = vector.shape_cast %3 : vector<128xf32> to vector<1x128xf32>
    %cst_4 = arith.constant 0.001953125 : f32
    %5 = vector.broadcast %cst_4 : f32 to vector<1x128xf32>
    %6 = arith.mulf %4, %5 : vector<1x128xf32>
    %7 = arith.mulf %2, %2 : vector<512x128xf32>
    %cst_5 = arith.constant dense<0.000000e+00> : vector<128xf32>
    %8 = vector.multi_reduction <add>, %7, %cst_5 [0] : vector<512x128xf32> to vector<128xf32>
    %9 = vector.shape_cast %8 : vector<128xf32> to vector<1x128xf32>
    %cst_6 = arith.constant 0.001953125 : f32
    %10 = vector.broadcast %cst_6 : f32 to vector<1x128xf32>
    %11 = arith.mulf %9, %10 : vector<1x128xf32>
    %12 = arith.mulf %6, %6 : vector<1x128xf32>
    %13 = arith.subf %11, %12 : vector<1x128xf32>
    %cst_7 = arith.constant 0.000000e+00 : f32
    %14 = vector.broadcast %cst_7 : f32 to vector<1x128xf32>
    %15 = arith.maximumf %13, %14 : vector<1x128xf32>
    %cst_8 = arith.constant 9.99999974E-6 : f32
    %16 = vector.broadcast %cst_8 : f32 to vector<1x128xf32>
    %17 = arith.addf %15, %16 : vector<1x128xf32>
    %18 = math.rsqrt %17 : vector<1x128xf32>
    %c0_9 = arith.constant 0 : index
    %c0_10 = arith.constant 0 : index
    %19 = vector.load %arg3[%c0_9, %c0_10] : memref<1x128xf32, #tpu.memory_space<vmem>>, vector<1x128xf32>
    %20 = arith.mulf %19, %18 : vector<1x128xf32>
    %c0_11 = arith.constant 0 : index
    %c0_12 = arith.constant 0 : index
    %21 = vector.load %arg4[%c0_11, %c0_12] : memref<1x128xf32, #tpu.memory_space<vmem>>, vector<1x128xf32>
    %22 = arith.mulf %6, %20 : vector<1x128xf32>
    %23 = arith.subf %21, %22 : vector<1x128xf32>
    %24 = vector.broadcast %20 : vector<1x128xf32> to vector<512x128xf32>
    %25 = arith.mulf %2, %24 : vector<512x128xf32>
    %26 = vector.broadcast %23 : vector<1x128xf32> to vector<512x128xf32>
    %27 = arith.addf %25, %26 : vector<512x128xf32>
    %cst_13 = arith.constant 0.000000e+00 : f32
    %28 = vector.broadcast %cst_13 : f32 to vector<512x128xf32>
    %29 = arith.maximumf %27, %28 : vector<512x128xf32>
    %c0_14 = arith.constant 0 : index
    %c0_15 = arith.constant 0 : index
    %30 = vector.load %arg5[%c0_14, %c0_15] : memref<512x128xf32, #tpu.memory_space<vmem>>, vector<512x128xf32>
    tpu.vector_store %arg5[%c0_14, %c0_15], %29 {strides = array<i32>} : memref<512x128xf32, #tpu.memory_space<vmem>>, vector<512x128xf32>,
    return
  }
  func.func @transform_0(%arg0: i32) -> (i32, i32) {
    %c0_i32 = arith.constant 0 : i32
    %c0_i32_0 = arith.constant 0 : i32
    %c0_i32_1 = arith.constant 0 : i32
    return %c0_i32, %c0_i32_0 : i32, i32
  }
  func.func @transform_1(%arg0: i32) -> (i32, i32) {
    %c0_i32 = arith.constant 0 : i32
    %c0_i32_0 = arith.constant 0 : i32
    %c0_i32_1 = arith.constant 0 : i32
    return %c0_i32, %c0_i32_0 : i32, i32
  }
  func.func @transform_2(%arg0: i32) -> (i32, i32) {
    %c0_i32 = arith.constant 0 : i32
    %c0_i32_0 = arith.constant 0 : i32
    %c0_i32_1 = arith.constant 0 : i32
    return %c0_i32, %c0_i32_0 : i32, i32
  }
  func.func @transform_3(%arg0: i32) -> (i32, i32) {
    %c0_i32 = arith.constant 0 : i32
    %c0_i32_0 = arith.constant 0 : i32
    %c0_i32_1 = arith.constant 0 : i32
    return %c0_i32, %c0_i32_0 : i32, i32
  }
  func.func @transform_4(%arg0: i32) -> (i32, i32) {
    %c0_i32 = arith.constant 0 : i32
    %c0_i32_0 = arith.constant 0 : i32
    %c0_i32_1 = arith.constant 0 : i32
    return %c0_i32, %c0_i32_0 : i32, i32
  }
}

</mosaic_0001>

<bundles_post_ra>
// kernel: tpu_custom_call.1
= control target key start
LH: loop header
LB: loop body
LE: loop exit
PB: predicated region body
PF: predicated region fallthrough
CT: control target
= control target key end

     0   :  { %vm263_vm0 = vcmask 293888   ;;  %vm360_vm1 = vcmask 1041408   ;;  %s2479_s0 = inlined_call_operand.vmem [shape: bf16[512,36], index: 0, kind: input, shape index: {}]   ;;  %s2480_s1 = inlined_call_operand.vmem [shape: bf16[36,128], index: 1, kind: input, shape index: {}]   ;;  %s2481_s2 = inlined_call_operand.vmem [shape: f32[1,128], index: 2, kind: input, shape index: {}]   ;;  %s2482_s3 = inlined_call_operand.vmem [shape: f32[1,128], index: 3, kind: input, shape index: {}]   ;;  %s2483_s4 = inlined_call_operand.hbm [shape: f32[512,128], index: 4, kind: output, shape index: {}]  }
   0x1   :  { %v1334_v0 = vld [vmem:[%s2480_s1] sm:$0xff]   ;;  %v1335_v1 = vld [vmem:[%s2480_s1 + $0x8] sm:$0xff]   ;;  %v1336_v2 = vld [vmem:[%s2480_s1 + $0x10] ss:$0 sps:$4 sm:$0x33]  }
   0x2   :  { %1253 = vmatprep.subr.bf16.mxu0 %v1334_v0  ;;  %v1337_v3 = vld [vmem:[%s2479_s0] sm:$0xff]   ;;  %1323 = vmatprep.subr.bf16.mxu1 %v1334_v0  ;;  %v362_v4 = vsel %vm360_vm1, %v1336_v2, 0  ;;  %v1338_v5 = vld [vmem:[%s2479_s0 + $0x8] sm:$0xff]   ;;  %v1339_v6 = vld [vmem:[%s2479_s0 + $0x10] sm:$0xff]  }
   0x3   :  { %1254 = vmatpush3.bf16.msra.mxu0 %v1334_v0  ;;  %1326 = vmatpush3.bf16.msra.mxu1 %v1334_v0  ;;  %v1340_v7 = vld [vmem:[%s2479_s0 + $0x18] sm:$0xff]   ;;  %v1341_v8 = vld [vmem:[%s2479_s0 + $0x20] sm:$0xff]   ;;  %v1354_v10 = vld [vmem:[%s2479_s0 + $0x88] sm:$0xff]  }
   0x4   :  { %1255 = vmatprep.subr.bf16.mxu0 %v1335_v1  ;;  %1259 = vmatprep.mubr.msk.bf16.mxu0 %vm263_vm0, %v1337_v3  ;;  %v1353_v9 = vld [vmem:[%s2479_s0 + $0x80] sm:$0xff]   ;;  %v1355_v11 = vld [vmem:[%s2479_s0 + $0x90] sm:$0xff]   ;;  %v1342_v12 = vld [vmem:[%s2479_s0 + $0x28] sm:$0xff]  }
   0x5   :  { %1324 = vmatprep.subr.bf16.mxu1 %v1335_v1  ;;  %1291 = vmatprep.mubr.msk.bf16.mxu1 %vm263_vm0, %v1353_v9  ;;  %v1343_v13 = vld [vmem:[%s2479_s0 + $0x30] sm:$0xff]   ;;  %v1356_v14 = vld [vmem:[%s2479_s0 + $0x98] sm:$0xff]   ;;  %v1357_v15 = vld [vmem:[%s2479_s0 + $0xa0] sm:$0xff]  }
   0x6   :  { %v1344_v16 = vld [vmem:[%s2479_s0 + $0x38] sm:$0xff]   ;;  %v1358_v17 = vld [vmem:[%s2479_s0 + $0xa8] sm:$0xff]  }
   0x7   :  { %1256 = vmatpush3.bf16.msra.mxu0 %v1335_v1  ;;  %1327 = vmatpush3.bf16.msra.mxu1 %v1335_v1 }
   0x8   :  { %1329 = vmatprep.subr.msk.bf16.mxu0 %vm360_vm1, %v1336_v2  ;;  %1330 = vmatprep.subr.msk.bf16.mxu1 %vm360_vm1, %v1336_v2 }
   0xb   :  { %1258 = vmatpush3.bf16.msra.mxu0 %v362_v4  ;;  %1328 = vmatpush3.bf16.msra.mxu1 %v362_v4 }
   0xe   :  { %1260 = vmatmul.mubr.msk.bf16.vlgmr.msra.gmra.mrb[0].mxu0 %vm263_vm0, %v1338_v5  ;;  %1292 = vmatmul.mubr.msk.bf16.vlgmr.msra.gmra.mrb[0].mxu1 %vm263_vm0, %v1354_v10 }
   0xf   :  { %1263 = vmatprep.mubr.msk.bf16.mxu0 %vm263_vm0, %v1339_v6  ;;  %1295 = vmatprep.mubr.msk.bf16.mxu1 %vm263_vm0, %v1355_v11 }
  0x16   :  { %1264 = vmatmul.mubr.msk.bf16.gmra.mrb[4].mxu0 %vm263_vm0, %v1340_v7  ;;  %1296 = vmatmul.mubr.msk.bf16.gmra.mrb[4].mxu1 %vm263_vm0, %v1356_v14 }
  0x17   :  { %1267 = vmatprep.mubr.msk.bf16.mxu0 %vm263_vm0, %v1341_v8  ;;  %1299 = vmatprep.mubr.msk.bf16.mxu1 %vm263_vm0, %v1357_v15 }
  0x1e   :  { %1268 = vmatmul.mubr.msk.bf16.gmra.mrb[8].mxu0 %vm263_vm0, %v1342_v12 }
  0x1f   :  { %1271 = vmatprep.mubr.msk.bf16.mxu0 %vm263_vm0, %v1343_v13 }
  0x20   :  { %9 = vsyncpa [#allocation3], 0  ;;  %v1345_v18 = vld [vmem:[%s2479_s0 + $0x40] sm:$0xff]   ;;  %v1359_v19 = vld [vmem:[%s2479_s0 + $0xb0] sm:$0xff]   ;;  %1300 = vmatmul.mubr.msk.bf16.gmra.mrb[8].mxu1 %vm263_vm0, %v1358_v17 }
  0x21   :  { %1303 = vmatprep.mubr.msk.bf16.mxu1 %vm263_vm0, %v1359_v19  ;;  %v1346_v20 = vld [vmem:[%s2479_s0 + $0x48] sm:$0xff]   ;;  %v1360_v21 = vld [vmem:[%s2479_s0 + $0xb8] sm:$0xff]   ;;  %v1347_v22 = vld [vmem:[%s2479_s0 + $0x50] sm:$0xff]  }
  0x22   :  { %v1361_v23 = vld [vmem:[%s2479_s0 + $0xc0] sm:$0xff]   ;;  %v1348_v24 = vld [vmem:[%s2479_s0 + $0x58] sm:$0xff]   ;;  %v1362_v25 = vld [vmem:[%s2479_s0 + $0xc8] sm:$0xff]  }
  0x23   :  { %v1349_v26 = vld [vmem:[%s2479_s0 + $0x60] sm:$0xff]   ;;  %v1363_v27 = vld [vmem:[%s2479_s0 + $0xd0] sm:$0xff]   ;;  %v1350_v28 = vld [vmem:[%s2479_s0 + $0x68] sm:$0xff]  }
  0x24   :  { %v1364_v29 = vld [vmem:[%s2479_s0 + $0xd8] sm:$0xff]   ;;  %v1351_v30 = vld [vmem:[%s2479_s0 + $0x70] sm:$0xff]   ;;  %v1365_v31 = vld [vmem:[%s2479_s0 + $0xe0] sm:$0xff]  }
  0x25   :  { %v1352_v32 = vld [vmem:[%s2479_s0 + $0x78] sm:$0xff]   ;;  %v1366_v33 = vld [vmem:[%s2479_s0 + $0xe8] sm:$0xff]   ;;  %v1367_v34 = vld [vmem:[%s2479_s0 + $0xf0] sm:$0xff]  }
  0x26   :  { %1272 = vmatmul.mubr.msk.bf16.gmra.mrb[12].mxu0 %vm263_vm0, %v1344_v16  ;;  %v1368_v35 = vld [vmem:[%s2479_s0 + $0xf8] sm:$0xff]  }
  0x27   :  { %1275 = vmatprep.mubr.msk.bf16.mxu0 %vm263_vm0, %v1345_v18 }
  0x28   :  { %1304 = vmatmul.mubr.msk.bf16.gmra.mrb[12].mxu1 %vm263_vm0, %v1360_v21 }
  0x29   :  { %1307 = vmatprep.mubr.msk.bf16.mxu1 %vm263_vm0, %v1361_v23 }
  0x2e   :  { %1276 = vmatmul.mubr.msk.bf16.gmra.mrb[16].mxu0 %vm263_vm0, %v1346_v20 }
  0x2f   :  { %1279 = vmatprep.mubr.msk.bf16.mxu0 %vm263_vm0, %v1347_v22 }
  0x30   :  { %1308 = vmatmul.mubr.msk.bf16.gmra.mrb[16].mxu1 %vm263_vm0, %v1362_v25 }
  0x31   :  { %1311 = vmatprep.mubr.msk.bf16.mxu1 %vm263_vm0, %v1363_v27 }
  0x36   :  { %1280 = vmatmul.mubr.msk.bf16.gmra.mrb[20].mxu0 %vm263_vm0, %v1348_v24 }
  0x37   :  { %1283 = vmatprep.mubr.msk.bf16.mxu0 %vm263_vm0, %v1349_v26 }
  0x38   :  { %1312 = vmatmul.mubr.msk.bf16.gmra.mrb[20].mxu1 %vm263_vm0, %v1364_v29 }
  0x39   :  { %1315 = vmatprep.mubr.msk.bf16.mxu1 %vm263_vm0, %v1365_v31 }
  0x3e   :  { %1284 = vmatmul.mubr.msk.bf16.gmra.mrb[24].mxu0 %vm263_vm0, %v1350_v28 }
  0x3f   :  { %1287 = vmatprep.mubr.msk.bf16.mxu0 %vm263_vm0, %v1351_v30 }
  0x40   :  { %1316 = vmatmul.mubr.msk.bf16.gmra.mrb[24].mxu1 %vm263_vm0, %v1366_v33 }
  0x41   :  { %1319 = vmatprep.mubr.msk.bf16.mxu1 %vm263_vm0, %v1367_v34 }
  0x46   :  { %1288 = vmatmul.mubr.msk.bf16.gmra.mrb[28].mxu0 %vm263_vm0, %v1352_v32 }
  0x48   :  { %1320 = vmatmul.mubr.msk.bf16.gmra.mrb[28].mxu1 %vm263_vm0, %v1368_v35 }
  0xe1   :  { %v1560_v36 = vpop.f32.mrb[0].mxu0  ;;  %v1582_v50 = vpop.f32.mrb[0].mxu1 }
  0xe2   :  { %v1562_v37 = vpop.f32.mrb[1].mxu0  ;;  %v725_v43 = vmul.f32 %v1560_v36, %v1560_v36  ;;  %v1586_v52 = vpop.f32.mrb[1].mxu1 }
  0xe3   :  { %v1564_v38 = vpop.f32.mrb[2].mxu0  ;;  %v723_v40 = vmul.f32 %v1562_v37, %v1562_v37  ;;  %2508 = vst [vmem:[#allocation5_spill] sm:$0xff] %v1586_v52  ;;  %v1593_v57 = vpop.f32.mrb[2].mxu1 }
  0xe4   :  { %v1566_v39 = vpop.f32.mrb[3].mxu0  ;;  %v726_v46 = vmul.f32 %v1564_v38, %v1564_v38  ;;  %v1597_v59 = vpop.f32.mrb[3].mxu1 }
  0xe5   :  { %v653_v41 = vadd.f32 %v1566_v39, %v1562_v37  ;;  %v724_v42 = vmul.f32 %v1566_v39, %v1566_v39  ;;  %2509 = vst [vmem:[#allocation6_spill] sm:$0xff] %v1597_v59 }
  0xe7   :  { %v654_v44 = vadd.f32 %v1560_v36, %v653_v41  ;;  %v787_v45 = vadd.f32 %v724_v42, %v723_v40 }
  0xe9   :  { %v788_v47 = vadd.f32 %v787_v45, %v725_v43  ;;  %v1579_v48 = vpop.f32.mrb[4].mxu0  ;;  %v655_v49 = vadd.f32 %v1564_v38, %v654_v44  ;;  %v1610_v6 = vpop.f32.mrb[4].mxu1 }
  0xea   :  { %v1584_v51 = vpop.f32.mrb[5].mxu0  ;;  %v729_v63 = vmul.f32 %v1579_v48, %v1579_v48  ;;  %v1614_v8 = vpop.f32.mrb[5].mxu1 }
  0xeb   :  { %v656_v53 = vadd.f32 %v655_v49, %v1584_v51  ;;  %v727_v54 = vmul.f32 %v1584_v51, %v1584_v51  ;;  %v789_v55 = vadd.f32 %v788_v47, %v726_v46  ;;  %v1591_v56 = vpop.f32.mrb[6].mxu0  ;;  %v1621_v13 = vpop.f32.mrb[6].mxu1 }
  0xec   :  { %v1595_v58 = vpop.f32.mrb[7].mxu0  ;;  %v730_v2 = vmul.f32 %v1591_v56, %v1591_v56  ;;  %v1625_v15 = vpop.f32.mrb[7].mxu1 }
  0xed   :  { %v790_v60 = vadd.f32 %v789_v55, %v727_v54  ;;  %v657_v61 = vadd.f32 %v656_v53, %v1595_v58  ;;  %v728_v62 = vmul.f32 %v1595_v58, %v1595_v58 }
  0xef   :  { %v658_v0 = vadd.f32 %v1579_v48, %v657_v61  ;;  %v791_v1 = vadd.f32 %v790_v60, %v728_v62 }
  0xf1   :  { %v792_v3 = vadd.f32 %v791_v1, %v729_v63  ;;  %v1607_v4 = vpop.f32.mrb[8].mxu0  ;;  %v659_v5 = vadd.f32 %v1591_v56, %v658_v0 }
  0xf2   :  { %v1612_v7 = vpop.f32.mrb[9].mxu0  ;;  %v733_v19 = vmul.f32 %v1607_v4, %v1607_v4 }
  0xf3   :  { %v660_v9 = vadd.f32 %v659_v5, %v1612_v7  ;;  %v731_v10 = vmul.f32 %v1612_v7, %v1612_v7  ;;  %v793_v11 = vadd.f32 %v792_v3, %v730_v2  ;;  %v1619_v12 = vpop.f32.mrb[10].mxu0  ;;  %v1638_v26 = vpop.f32.mrb[8].mxu1 }
  0xf4   :  { %v1623_v14 = vpop.f32.mrb[11].mxu0  ;;  %v734_v22 = vmul.f32 %v1619_v12, %v1619_v12  ;;  %v1642_v28 = vpop.f32.mrb[9].mxu1 }
  0xf5   :  { %v794_v16 = vadd.f32 %v793_v11, %v731_v10  ;;  %v661_v17 = vadd.f32 %v660_v9, %v1623_v14  ;;  %v732_v18 = vmul.f32 %v1623_v14, %v1623_v14  ;;  %v1649_v33 = vpop.f32.mrb[10].mxu1 }
  0xf6   :  { %v1653_v35 = vpop.f32.mrb[11].mxu1 }
  0xf7   :  { %v662_v20 = vadd.f32 %v1607_v4, %v661_v17  ;;  %v795_v21 = vadd.f32 %v794_v16, %v732_v18 }
  0xf9   :  { %v796_v23 = vadd.f32 %v795_v21, %v733_v19  ;;  %v1635_v24 = vpop.f32.mrb[12].mxu0  ;;  %v663_v25 = vadd.f32 %v1619_v12, %v662_v20 }
  0xfa   :  { %v1640_v27 = vpop.f32.mrb[13].mxu0  ;;  %v737_v43 = vmul.f32 %v1635_v24, %v1635_v24 }
  0xfb   :  { %v664_v29 = vadd.f32 %v663_v25, %v1640_v27  ;;  %v735_v30 = vmul.f32 %v1640_v27, %v1640_v27  ;;  %v797_v31 = vadd.f32 %v796_v23, %v734_v22  ;;  %v1647_v32 = vpop.f32.mrb[14].mxu0  ;;  %v1666_v54 = vpop.f32.mrb[12].mxu1 }
  0xfc   :  { %v1651_v34 = vpop.f32.mrb[15].mxu0  ;;  %v738_v46 = vmul.f32 %v1647_v32, %v1647_v32  ;;  %v1670_v60 = vpop.f32.mrb[13].mxu1 }
  0xfd   :  { %v798_v40 = vadd.f32 %v797_v31, %v735_v30  ;;  %v665_v41 = vadd.f32 %v664_v29, %v1651_v34  ;;  %v736_v42 = vmul.f32 %v1651_v34, %v1651_v34  ;;  %v1677_v1 = vpop.f32.mrb[14].mxu1 }
  0xfe   :  { %v1681_v3 = vpop.f32.mrb[15].mxu1 }
  0xff   :  { %v666_v44 = vadd.f32 %v1635_v24, %v665_v41  ;;  %v799_v45 = vadd.f32 %v798_v40, %v736_v42 }
 0x101   :  { %v800_v47 = vadd.f32 %v799_v45, %v737_v43  ;;  %v1663_v49 = vpop.f32.mrb[16].mxu0  ;;  %v667_v53 = vadd.f32 %v1647_v32, %v666_v44 }
 0x102   :  { %v1668_v55 = vpop.f32.mrb[17].mxu0  ;;  %v741_v11 = vmul.f32 %v1663_v49, %v1663_v49 }
 0x103   :  { %v668_v61 = vadd.f32 %v667_v53, %v1668_v55  ;;  %v739_v62 = vmul.f32 %v1668_v55, %v1668_v55  ;;  %v801_v63 = vadd.f32 %v800_v47, %v738_v46  ;;  %v1675_v0 = vpop.f32.mrb[18].mxu0  ;;  %v1694_v22 = vpop.f32.mrb[16].mxu1 }
 0x104   :  { %2510 = vst [vmem:[#allocation7_spill] sm:$0xff] %v1675_v0  ;;  %v1679_v2 = vpop.f32.mrb[19].mxu0  ;;  %v742_v18 = vmul.f32 %v1675_v0, %v1675_v0  ;;  %v1698_v25 = vpop.f32.mrb[17].mxu1 }
 0x105   :  { %v802_v5 = vadd.f32 %v801_v63, %v739_v62  ;;  %v669_v9 = vadd.f32 %v668_v61, %v1679_v2  ;;  %v740_v10 = vmul.f32 %v1679_v2, %v1679_v2  ;;  %v1705_v41 = vpop.f32.mrb[18].mxu1 }
 0x106   :  { %v1709_v43 = vpop.f32.mrb[19].mxu1 }
 0x107   :  { %v670_v16 = vadd.f32 %v1663_v49, %v669_v9  ;;  %v803_v17 = vadd.f32 %v802_v5, %v740_v10 }
 0x109   :  { %v804_v19 = vadd.f32 %v803_v17, %v741_v11  ;;  %v1691_v20 = vpop.f32.mrb[20].mxu0  ;;  %v671_v21 = vadd.f32 %v1675_v0, %v670_v16 }
 0x10a   :  { %2511 = vst [vmem:[#allocation8_spill] sm:$0xff] %v1691_v20  ;;  %v1696_v23 = vpop.f32.mrb[21].mxu0  ;;  %v745_v47 = vmul.f32 %v1691_v20, %v1691_v20 }
 0x10b   :  { %2512 = vst [vmem:[#allocation9_spill] sm:$0xff] %v1696_v23  ;;  %v672_v29 = vadd.f32 %v671_v21, %v1696_v23  ;;  %v743_v30 = vmul.f32 %v1696_v23, %v1696_v23  ;;  %v805_v31 = vadd.f32 %v804_v19, %v742_v18  ;;  %v1703_v40 = vpop.f32.mrb[22].mxu0  ;;  %v1722_v10 = vpop.f32.mrb[20].mxu1 }
 0x10c   :  { %2513 = vst [vmem:[#allocation10_spill] sm:$0xff] %v1703_v40  ;;  %v1707_v42 = vpop.f32.mrb[23].mxu0  ;;  %v746_v62 = vmul.f32 %v1703_v40, %v1703_v40  ;;  %2516 = vst [vmem:[#allocation13_spill] sm:$0xff] %v1722_v10  ;;  %v1726_v16 = vpop.f32.mrb[21].mxu1 }
 0x10d   :  { %2514 = vst [vmem:[#allocation11_spill] sm:$0xff] %v1707_v42  ;;  %v806_v44 = vadd.f32 %v805_v31, %v743_v30  ;;  %v673_v45 = vadd.f32 %v672_v29, %v1707_v42  ;;  %v744_v46 = vmul.f32 %v1707_v42, %v1707_v42  ;;  %v1733_v29 = vpop.f32.mrb[22].mxu1 }
 0x10e   :  { %2519 = vst [vmem:[#allocation16_spill] sm:$0xff] %v1733_v29  ;;  %v1737_v31 = vpop.f32.mrb[23].mxu1 }
 0x10f   :  { %v674_v53 = vadd.f32 %v1691_v20, %v673_v45  ;;  %v807_v61 = vadd.f32 %v806_v44, %v744_v46  ;;  %2521 = vst [vmem:[#allocation18_spill] sm:$0xff] %v1737_v31 }
 0x111   :  { %v808_v63 = vadd.f32 %v807_v61, %v745_v47  ;;  %v1719_v5 = vpop.f32.mrb[24].mxu0  ;;  %v675_v9 = vadd.f32 %v1703_v40, %v674_v53 }
 0x112   :  { %2515 = vst [vmem:[#allocation12_spill] sm:$0xff] %v1719_v5  ;;  %v1724_v11 = vpop.f32.mrb[25].mxu0  ;;  %v749_v47 = vmul.f32 %v1719_v5, %v1719_v5 }
 0x113   :  { %2517 = vst [vmem:[#allocation14_spill] sm:$0xff] %v1724_v11  ;;  %v676_v17 = vadd.f32 %v675_v9, %v1724_v11  ;;  %v747_v18 = vmul.f32 %v1724_v11, %v1724_v11  ;;  %v809_v19 = vadd.f32 %v808_v63, %v746_v62  ;;  %v1731_v21 = vpop.f32.mrb[26].mxu0 }
 0x114   :  { %2518 = vst [vmem:[#allocation15_spill] sm:$0xff] %v1731_v21  ;;  %v1735_v30 = vpop.f32.mrb[27].mxu0  ;;  %v750_v62 = vmul.f32 %v1731_v21, %v1731_v21 }
 0x115   :  { %2520 = vst [vmem:[#allocation17_spill] sm:$0xff] %v1735_v30  ;;  %v810_v44 = vadd.f32 %v809_v19, %v747_v18  ;;  %v677_v45 = vadd.f32 %v676_v17, %v1735_v30  ;;  %v748_v46 = vmul.f32 %v1735_v30, %v1735_v30  ;;  %v1750_v18 = vpop.f32.mrb[24].mxu1 }
 0x116   :  { %2523 = vst [vmem:[#allocation20_spill] sm:$0xff] %v1750_v18  ;;  %v1754_v19 = vpop.f32.mrb[25].mxu1 }
 0x117   :  { %v678_v53 = vadd.f32 %v1719_v5, %v677_v45  ;;  %v811_v61 = vadd.f32 %v810_v44, %v748_v46  ;;  %2525 = vst [vmem:[#allocation22_spill] sm:$0xff] %v1754_v19  ;;  %v1761_v5 = vpop.f32.mrb[26].mxu1 }
 0x118   :  { %2527 = vst [vmem:[#allocation24_spill] sm:$0xff] %v1761_v5 }
 0x119   :  { %v812_v63 = vadd.f32 %v811_v61, %v749_v47  ;;  %v1747_v9 = vpop.f32.mrb[28].mxu0  ;;  %v679_v11 = vadd.f32 %v1731_v21, %v678_v53  ;;  %v1765_v61 = vpop.f32.mrb[27].mxu1 }
 0x11a   :  { %2522 = vst [vmem:[#allocation19_spill] sm:$0xff] %v1747_v9  ;;  %v1752_v17 = vpop.f32.mrb[29].mxu0  ;;  %2529 = vst [vmem:[#allocation26_spill] sm:$0xff] %v1765_v61 }
 0x11b   :  { %2524 = vst [vmem:[#allocation21_spill] sm:$0xff] %v1752_v17  ;;  %v680_v30 = vadd.f32 %v679_v11, %v1752_v17  ;;  %v751_v45 = vmul.f32 %v1752_v17, %v1752_v17  ;;  %v813_v44 = vadd.f32 %v812_v63, %v750_v62  ;;  %v1759_v46 = vpop.f32.mrb[30].mxu0  ;;  %v753_v11 = vmul.f32 %v1747_v9, %v1747_v9 }
 0x11c   :  { %2526 = vst [vmem:[#allocation23_spill] sm:$0xff] %v1759_v46  ;;  %v1763_v47 = vpop.f32.mrb[31].mxu0  ;;  %v754_v63 = vmul.f32 %v1759_v46, %v1759_v46 }
 0x11d   :  { %2528 = vst [vmem:[#allocation25_spill] sm:$0xff] %v1763_v47  ;;  %v814_v53 = vadd.f32 %v813_v44, %v751_v45  ;;  %v681_v21 = vadd.f32 %v680_v30, %v1763_v47  ;;  %v752_v40 = vmul.f32 %v1763_v47, %v1763_v47  ;;  %v755_v45 = vmul.f32 %v1586_v52, %v1586_v52  ;;  %v1778_v44 = vpop.f32.mrb[28].mxu1 }
 0x11e   :  { %2530 = vst [vmem:[#allocation27_spill] sm:$0xff] %v1778_v44  ;;  %v1780_v30 = vpop.f32.mrb[29].mxu1 }
 0x11f   :  { %v682_v17 = vadd.f32 %v1747_v9, %v681_v21  ;;  %v815_v62 = vadd.f32 %v814_v53, %v752_v40  ;;  %2531 = vst [vmem:[#allocation28_spill] sm:$0xff] %v1780_v30  ;;  %v1783_v0 = vpop.f32.mrb[30].mxu1  ;;  %v760_v9 = vmul.f32 %v1625_v15, %v1625_v15 }
 0x120   :  { %v1785_v21 = vpop.f32.mrb[31].mxu1 }
 0x121   :  { %v816_v20 = vadd.f32 %v815_v62, %v753_v11  ;;  %v683_v42 = vadd.f32 %v1759_v46, %v682_v17  ;;  %v756_v17 = vmul.f32 %v1597_v59, %v1597_v59  ;;  %v757_v11 = vmul.f32 %v1582_v50, %v1582_v50 }
 0x123   :  { %v684_v47 = vadd.f32 %v683_v42, %v1586_v52  ;;  %v817_v23 = vadd.f32 %v816_v20, %v754_v63  ;;  %v758_v42 = vmul.f32 %v1593_v57, %v1593_v57 }
 0x125   :  { %v818_v40 = vadd.f32 %v817_v23, %v755_v45  ;;  %v685_v53 = vadd.f32 %v684_v47, %v1597_v59  ;;  %v759_v23 = vmul.f32 %v1614_v8, %v1614_v8 }
 0x127   :  { %v686_v62 = vadd.f32 %v1582_v50, %v685_v53  ;;  %v819_v46 = vadd.f32 %v818_v40, %v756_v17  ;;  %v761_v40 = vmul.f32 %v1610_v6, %v1610_v6  ;;  %v762_v17 = vmul.f32 %v1621_v13, %v1621_v13 }
 0x129   :  { %v820_v20 = vadd.f32 %v819_v46, %v757_v11  ;;  %v687_v63 = vadd.f32 %v1593_v57, %v686_v62 }
 0x12b   :  { %v688_v47 = vadd.f32 %v687_v63, %v1614_v8  ;;  %v821_v45 = vadd.f32 %v820_v20, %v758_v42  ;;  %v763_v42 = vmul.f32 %v1642_v28, %v1642_v28 }
 0x12d   :  { %v822_v52 = vadd.f32 %v821_v45, %v759_v23  ;;  %v689_v59 = vadd.f32 %v688_v47, %v1625_v15  ;;  %v764_v45 = vmul.f32 %v1653_v35, %v1653_v35 }
 0x12f   :  { %v690_v53 = vadd.f32 %v1610_v6, %v689_v59  ;;  %v823_v46 = vadd.f32 %v822_v52, %v760_v9  ;;  %v765_v52 = vmul.f32 %v1638_v26, %v1638_v26 }
 0x131   :  { %v824_v11 = vadd.f32 %v823_v46, %v761_v40  ;;  %v691_v62 = vadd.f32 %v1621_v13, %v690_v53  ;;  %v766_v40 = vmul.f32 %v1649_v33, %v1649_v33 }
 0x133   :  { %v692_v20 = vadd.f32 %v691_v62, %v1642_v28  ;;  %v825_v63 = vadd.f32 %v824_v11, %v762_v17  ;;  %v767_v17 = vmul.f32 %v1670_v60, %v1670_v60 }
 0x135   :  { %v826_v23 = vadd.f32 %v825_v63, %v763_v42  ;;  %v693_v47 = vadd.f32 %v692_v20, %v1653_v35  ;;  %v768_v63 = vmul.f32 %v1681_v3, %v1681_v3 }
 0x137   :  { %v694_v59 = vadd.f32 %v1638_v26, %v693_v47  ;;  %v827_v9 = vadd.f32 %v826_v23, %v764_v45  ;;  %v769_v23 = vmul.f32 %v1666_v54, %v1666_v54 }
 0x139   :  { %v828_v53 = vadd.f32 %v827_v9, %v765_v52  ;;  %v695_v46 = vadd.f32 %v1649_v33, %v694_v59  ;;  %v770_v52 = vmul.f32 %v1677_v1, %v1677_v1 }
 0x13b   :  { %v696_v11 = vadd.f32 %v695_v46, %v1670_v60  ;;  %v829_v62 = vadd.f32 %v828_v53, %v766_v40  ;;  %v771_v40 = vmul.f32 %v1698_v25, %v1698_v25 }
 0x13d   :  { %v830_v42 = vadd.f32 %v829_v62, %v767_v17  ;;  %v697_v20 = vadd.f32 %v696_v11, %v1681_v3  ;;  %v772_v62 = vmul.f32 %v1709_v43, %v1709_v43 }
 0x13f   :  { %v698_v47 = vadd.f32 %v1666_v54, %v697_v20  ;;  %v831_v45 = vadd.f32 %v830_v42, %v768_v63  ;;  %v773_v42 = vmul.f32 %v1694_v22, %v1694_v22 }
 0x141   :  { %v832_v59 = vadd.f32 %v831_v45, %v769_v23  ;;  %v699_v9 = vadd.f32 %v1677_v1, %v698_v47  ;;  %v774_v23 = vmul.f32 %v1705_v41, %v1705_v41 }
 0x143   :  { %v700_v53 = vadd.f32 %v699_v9, %v1698_v25  ;;  %v833_v46 = vadd.f32 %v832_v59, %v770_v52  ;;  %v775_v52 = vmul.f32 %v1726_v16, %v1726_v16 }
 0x145   :  { %v834_v17 = vadd.f32 %v833_v46, %v771_v40  ;;  %v701_v11 = vadd.f32 %v700_v53, %v1709_v43  ;;  %v776_v46 = vmul.f32 %v1737_v31, %v1737_v31 }
 0x147   :  { %v702_v20 = vadd.f32 %v1694_v22, %v701_v11  ;;  %v835_v63 = vadd.f32 %v834_v17, %v772_v62  ;;  %v777_v17 = vmul.f32 %v1722_v10, %v1722_v10 }
 0x149   :  { %v836_v47 = vadd.f32 %v835_v63, %v773_v42  ;;  %v703_v45 = vadd.f32 %v1705_v41, %v702_v20  ;;  %v778_v42 = vmul.f32 %v1733_v29, %v1733_v29 }
 0x14b   :  { %v704_v59 = vadd.f32 %v703_v45, %v1726_v16  ;;  %v837_v9 = vadd.f32 %v836_v47, %v774_v23  ;;  %v779_v23 = vmul.f32 %v1754_v19, %v1754_v19 }
 0x14d   :  { %v838_v40 = vadd.f32 %v837_v9, %v775_v52  ;;  %v705_v53 = vadd.f32 %v704_v59, %v1737_v31  ;;  %v780_v9 = vmul.f32 %v1765_v61, %v1765_v61 }
 0x14f   :  { %v706_v11 = vadd.f32 %v1722_v10, %v705_v53  ;;  %v839_v62 = vadd.f32 %v838_v40, %v776_v46  ;;  %v781_v40 = vmul.f32 %v1750_v18, %v1750_v18 }
 0x151   :  { %v840_v20 = vadd.f32 %v839_v62, %v777_v17  ;;  %v707_v63 = vadd.f32 %v1733_v29, %v706_v11  ;;  %v782_v17 = vmul.f32 %v1761_v5, %v1761_v5 }
 0x153   :  { %v708_v47 = vadd.f32 %v707_v63, %v1754_v19  ;;  %v841_v45 = vadd.f32 %v840_v20, %v778_v42  ;;  %v783_v42 = vmul.f32 %v1780_v30, %v1780_v30 }
 0x155   :  { %v842_v52 = vadd.f32 %v841_v45, %v779_v23  ;;  %v709_v59 = vadd.f32 %v708_v47, %v1765_v61  ;;  %v784_v45 = vmul.f32 %v1785_v21, %v1785_v21 }
 0x157   :  { %v710_v53 = vadd.f32 %v1750_v18, %v709_v59  ;;  %v843_v46 = vadd.f32 %v842_v52, %v780_v9  ;;  %v785_v52 = vmul.f32 %v1778_v44, %v1778_v44 }
 0x159   :  { %v844_v11 = vadd.f32 %v843_v46, %v781_v40  ;;  %v711_v62 = vadd.f32 %v1761_v5, %v710_v53  ;;  %v786_v40 = vmul.f32 %v1783_v0, %v1783_v0 }
 0x15b   :  { %v712_v20 = vadd.f32 %v711_v62, %v1780_v30  ;;  %v845_v63 = vadd.f32 %v844_v11, %v782_v17 }
 0x15d   :  { %v846_v23 = vadd.f32 %v845_v63, %v783_v42  ;;  %v713_v47 = vadd.f32 %v712_v20, %v1785_v21 }
 0x15f   :  { %v714_v59 = vadd.f32 %v1778_v44, %v713_v47  ;;  %v847_v9 = vadd.f32 %v846_v23, %v784_v45 }
 0x161   :  { %v715_v53 = vadd.f32 %v1783_v0, %v714_v59  ;;  %v848_v46 = vadd.f32 %v847_v9, %v785_v52  ;;  %v868_v52 = vlaneseq }
 0x163   :  { %v716_v62 = vrot.slane %v715_v53, 4  ;;  %v849_v17 = vadd.f32 %v848_v46, %v786_v40  ;;  %v869_v9 = vshrl.u32 %v868_v52, 7  ;;  %v862_v40 = vld [vmem:[%s2481_s2] sm:$0x1]  ;;  %s1395_s2 = smov [#allocation2]  }
 0x165   :  { %v717_v11 = vadd.f32 %v716_v62, %v715_v53  ;;  %v850_v42 = vrot.slane %v849_v17, 4  ;;  %v870_v53 = vsub.s32 0, %v869_v9  ;;  %v2538_v9 = vld [vmem:[#allocation17_spill] sm:$0xff] }
 0x167   :  { %v718_v20 = vrot.slane %v717_v11, 2  ;;  %v851_v63 = vadd.f32 %v850_v42, %v849_v17  ;;  %v2532_v42 = vld [vmem:[#allocation7_spill] sm:$0xff] }
 0x169   :  { %v719_v30 = vadd.f32 %v718_v20, %v717_v11  ;;  %v852_v5 = vrot.slane %v851_v63, 2 }
 0x16b   :  { %v720_v18 = vrot.slane %v719_v30, 1  ;;  %v853_v61 = vadd.f32 %v852_v5, %v851_v63  ;;  %v864_v5 = vld [vmem:[%s2482_s3] sm:$0x1]  ;;  %s1140_s3 = sshll.u32 %s1395_s2, 4  ;;  %s2458_s3 = int_to_ptr.vmem [resolvable:$true] %s1140_s3 }
 0x16c   :  { %v2533_v63 = vld [vmem:[#allocation9_spill] sm:$0xff]  ;;  %s1371_s7 = scalar_lea.vmem %s2458_s3, 8192  ;;  %p1376_p1 = scmp.lt.s32.totalorder %s2458_s3, %s2458_s3 }
 0x16d   :  { %v721_v19 = vadd.f32 %v720_v18, %v719_v30  ;;  %v854_v29 = vrot.slane %v853_v61, 1  ;;  %p1372_p0 = scmp.ne.s32.totalorder %s2458_s3, %s1371_s7  ;;  %p1377_p2 = scmp.lt.s32.totalorder %s1371_s7, %s1371_s7 }
 0x16f   :  { %v722_v47 = vmul.f32 0.001953125, %v721_v19  ;;  %v855_v23 = vadd.f32 %v854_v29, %v853_v61  ;;  %p1378_p3 = por %p1377_p2, %p1376_p1 }
 0x171   :  { %v856_v45 = vmul.f32 0.001953125, %v855_v23  ;;  %v857_v44 = vmul.f32 %v722_v47, %v722_v47  ;;  %p1379_p4 = pnand %p1378_p3, %p1372_p0 }
 0x173   :  { %v858_v10 = vsub.f32 %v856_v45, %v857_v44 }
 0x175   :  { %v859_v31 = vmax.f32 %v858_v10, 0.0 }
 0x177   :  { %v860_v59 = vadd.f32 1e-05, %v859_v31 }
 0x179   :  { %1369 = vrsqrt.f32 %v860_v59  ;;  %v2537_v59 = vld [vmem:[#allocation14_spill] sm:$0xff] }
 0x183   :  { %v1370_v46 = vpop.eup %1369 }
 0x184   :  { %v863_v62 = vmul.f32 %v1370_v46, %v862_v40 }
 0x186   :  { %v865_v29 = vmul.f32 %v863_v62, %v722_v47  ;;  %v1886_v18 = vrot.slane %v863_v62, %v870_v53  ;;  %v2534_v47 = vld [vmem:[#allocation11_spill] sm:$0xff] }
 0x187   :  { %v2540_v62 = vld [vmem:[#allocation15_spill] sm:$0xff] }
 0x188   :  { %v866_v19 = vsub.f32 %v864_v5, %v865_v29  ;;  %v934_v10 = vmul.f32 %v1886_v18, %v1785_v21  ;;  %v1892_v31 = vmul.f32 %v1886_v18, %v1562_v37  ;;  %v1896_v61 = vmul.f32 %v1886_v18, %v1566_v39  ;;  %v2541_v29 = vld [vmem:[#allocation21_spill] sm:$0xff] }
 0x189   :  { %v1900_v44 = vmul.f32 %v1560_v36, %v1886_v18  ;;  %v1904_v30 = vmul.f32 %v1564_v38, %v1886_v18  ;;  %v1908_v17 = vmul.f32 %v1886_v18, %v1584_v51  ;;  %v1912_v37 = vmul.f32 %v1886_v18, %v1595_v58 }
 0x18a   :  { %v1914_v21 = vrot.slane %v866_v19, %v870_v53  ;;  %v1918_v39 = vmul.f32 %v1579_v48, %v1886_v18  ;;  %v1922_v36 = vmul.f32 %v1591_v56, %v1886_v18  ;;  %v1926_v38 = vmul.f32 %v1886_v18, %v1612_v7  ;;  %v2539_v53 = vld [vmem:[#allocation12_spill] sm:$0xff] }
 0x18b   :  { %v1930_v51 = vmul.f32 %v1886_v18, %v1623_v14  ;;  %v1934_v58 = vmul.f32 %v1607_v4, %v1886_v18  ;;  %v1938_v48 = vmul.f32 %v1619_v12, %v1886_v18  ;;  %v1942_v56 = vmul.f32 %v1886_v18, %v1640_v27 }
 0x18c   :  { %v1004_v11 = vadd.f32 %v1914_v21, %v934_v10  ;;  %v1947_v7 = vmul.f32 %v1886_v18, %v1651_v34  ;;  %v1951_v14 = vmul.f32 %v1635_v24, %v1886_v18  ;;  %v1955_v4 = vmul.f32 %v1647_v32, %v1886_v18  ;;  %v2542_v10 = vld [vmem:[#allocation25_spill] sm:$0xff] }
 0x18d   :  { %v1959_v12 = vmul.f32 %v1886_v18, %v1668_v55  ;;  %v1963_v27 = vmul.f32 %v1886_v18, %v1679_v2  ;;  %v1967_v34 = vmul.f32 %v1663_v49, %v1886_v18  ;;  %v1971_v24 = vmul.f32 %v2532_v42, %v1886_v18  ;;  %v2535_v2 = vld [vmem:[#allocation8_spill] sm:$0xff]  ;;  %v2536_v49 = vld [vmem:[#allocation10_spill] sm:$0xff]  ;;  %v2543_v42 = vld [vmem:[#allocation19_spill] sm:$0xff] }
 0x18e   :  { %v1068_v20 = vmax.f32 %v1004_v11, 0.0  ;;  %v1975_v32 = vmul.f32 %v1886_v18, %v2533_v63  ;;  %v1979_v55 = vmul.f32 %v1886_v18, %v2534_v47  ;;  %v1983_v23 = vmul.f32 %v2535_v2, %v1886_v18  ;;  %v2544_v47 = vld [vmem:[#allocation23_spill] sm:$0xff] }
 0x18f   :  { %v1987_v45 = vmul.f32 %v2536_v49, %v1886_v18  ;;  %v1991_v52 = vmul.f32 %v1886_v18, %v2537_v59  ;;  %v1995_v40 = vmul.f32 %v1886_v18, %v2538_v9  ;;  %v1999_v46 = vmul.f32 %v2539_v53, %v1886_v18  ;;  %v2546_v59 = vld [vmem:[#allocation6_spill] sm:$0xff] }
 0x190   :  { %1132 = vst [vmem:[#allocation2 + $0x1e8] sm:$0xff] %v1068_v20  ;;  %v2003_v5 = vmul.f32 %v2540_v62, %v1886_v18  ;;  %v2007_v19 = vmul.f32 %v1886_v18, %v2541_v29  ;;  %v2011_v11 = vmul.f32 %v1886_v18, %v2542_v10  ;;  %v2015_v63 = vmul.f32 %v2543_v42, %v1886_v18  ;;  %v2545_v20 = vld [vmem:[#allocation5_spill] sm:$0xff] }
 0x191   :  { %v2019_v2 = vmul.f32 %v2544_v47, %v1886_v18  ;;  %v2023_v49 = vmul.f32 %v1886_v18, %v2545_v20  ;;  %v2027_v9 = vmul.f32 %v1886_v18, %v2546_v59  ;;  %v2031_v53 = vmul.f32 %v1582_v50, %v1886_v18  ;;  %v2550_v47 = vld [vmem:[#allocation18_spill] sm:$0xff]  ;;  %v2552_v20 = vld [vmem:[#allocation13_spill] sm:$0xff]  ;;  %v2554_v59 = vld [vmem:[#allocation16_spill] sm:$0xff] }
 0x192   :  { %v2035_v62 = vmul.f32 %v1593_v57, %v1886_v18  ;;  %v2039_v29 = vmul.f32 %v1886_v18, %v1614_v8  ;;  %v2043_v10 = vmul.f32 %v1886_v18, %v1625_v15  ;;  %v2047_v42 = vmul.f32 %v1610_v6, %v1886_v18 }
 0x193   :  { %v2051_v50 = vmul.f32 %v1621_v13, %v1886_v18  ;;  %v2055_v57 = vmul.f32 %v1886_v18, %v1642_v28  ;;  %v2059_v8 = vmul.f32 %v1886_v18, %v1653_v35  ;;  %v2063_v15 = vmul.f32 %v1638_v26, %v1886_v18 }
 0x194   :  { %v2067_v6 = vmul.f32 %v1649_v33, %v1886_v18  ;;  %v2071_v13 = vmul.f32 %v1886_v18, %v1670_v60  ;;  %v2075_v28 = vmul.f32 %v1886_v18, %v1681_v3  ;;  %v2079_v35 = vmul.f32 %v1666_v54, %v1886_v18 }
 0x195   :  { %v2083_v26 = vmul.f32 %v1677_v1, %v1886_v18  ;;  %v2087_v33 = vmul.f32 %v1886_v18, %v1698_v25  ;;  %v2091_v60 = vmul.f32 %v1886_v18, %v1709_v43  ;;  %v2095_v3 = vmul.f32 %v1694_v22, %v1886_v18 }
 0x196   :  { %v2099_v54 = vmul.f32 %v1705_v41, %v1886_v18  ;;  %v2103_v1 = vmul.f32 %v1886_v18, %v1726_v16  ;;  %v2107_v25 = vmul.f32 %v1886_v18, %v2550_v47  ;;  %v2111_v43 = vmul.f32 %v2552_v20, %v1886_v18 }
 0x197   :  { %2547 = vst [vmem:[#allocation7_spill] sm:$0xff] %v2095_v3  ;;  %v2115_v22 = vmul.f32 %v2554_v59, %v1886_v18  ;;  %v2556_v3 = vld [vmem:[#allocation22_spill] sm:$0xff] }
 0x198   :  { %2548 = vst [vmem:[#allocation9_spill] sm:$0xff] %v2099_v54  ;;  %2549 = vst [vmem:[#allocation11_spill] sm:$0xff] %v2103_v1  ;;  %v2119_v41 = vmul.f32 %v1886_v18, %v2556_v3  ;;  %v2557_v54 = vld [vmem:[#allocation26_spill] sm:$0xff]  ;;  %v2558_v1 = vld [vmem:[#allocation20_spill] sm:$0xff] }
 0x199   :  { %2551 = vst [vmem:[#allocation8_spill] sm:$0xff] %v2107_v25  ;;  %2553 = vst [vmem:[#allocation10_spill] sm:$0xff] %v2111_v43  ;;  %v2123_v16 = vmul.f32 %v1886_v18, %v2557_v54  ;;  %v2127_v47 = vmul.f32 %v2558_v1, %v1886_v18  ;;  %v2559_v25 = vld [vmem:[#allocation24_spill] sm:$0xff]  ;;  %v2143_v54 = vmul.f32 %v1783_v0, %v1886_v18 }
 0x19a   :  { %2555 = vst [vmem:[#allocation14_spill] sm:$0xff] %v2115_v22  ;;  %v2131_v20 = vmul.f32 %v2559_v25, %v1886_v18  ;;  %v2560_v43 = vld [vmem:[#allocation28_spill] sm:$0xff]  ;;  %v2561_v22 = vld [vmem:[#allocation27_spill] sm:$0xff]  ;;  %v2147_v1 = vadd.f32 %v1914_v21, %v1892_v31  ;;  %v2151_v25 = vadd.f32 %v1914_v21, %v1896_v61  ;;  %v2163_v0 = vadd.f32 %v1914_v21, %v1908_v17 }
 0x19b   :  { %v2135_v59 = vmul.f32 %v1886_v18, %v2560_v43  ;;  %v2139_v3 = vmul.f32 %v2561_v22, %v1886_v18  ;;  %v2155_v43 = vadd.f32 %v1914_v21, %v1900_v44  ;;  %v2159_v22 = vadd.f32 %v1914_v21, %v1904_v30 }
 0x19c   :  { %v2167_v18 = vadd.f32 %v1914_v21, %v1912_v37  ;;  %v2171_v31 = vadd.f32 %v1914_v21, %v1918_v39  ;;  %v2175_v61 = vadd.f32 %v1914_v21, %v1922_v36  ;;  %v2179_v44 = vadd.f32 %v1914_v21, %v1926_v38 }
 0x19d   :  { %v2183_v30 = vadd.f32 %v1914_v21, %v1930_v51  ;;  %v2187_v17 = vadd.f32 %v1914_v21, %v1934_v58  ;;  %v2191_v37 = vadd.f32 %v1914_v21, %v1938_v48  ;;  %v2195_v39 = vadd.f32 %v1914_v21, %v1942_v56 }
 0x19e   :  { %v2199_v36 = vadd.f32 %v1914_v21, %v1947_v7  ;;  %v2203_v38 = vadd.f32 %v1914_v21, %v1951_v14  ;;  %v2207_v51 = vadd.f32 %v1914_v21, %v1955_v4  ;;  %v2211_v58 = vadd.f32 %v1914_v21, %v1959_v12 }
 0x19f   :  { %v2215_v48 = vadd.f32 %v1914_v21, %v1963_v27  ;;  %v2219_v56 = vadd.f32 %v1914_v21, %v1967_v34  ;;  %v2223_v7 = vadd.f32 %v1914_v21, %v1971_v24  ;;  %v2227_v14 = vadd.f32 %v1914_v21, %v1975_v32 }
 0x1a0   :  { %v2231_v4 = vadd.f32 %v1914_v21, %v1979_v55  ;;  %v2235_v12 = vadd.f32 %v1914_v21, %v1983_v23  ;;  %v2239_v27 = vadd.f32 %v1914_v21, %v1987_v45  ;;  %v2243_v34 = vadd.f32 %v1914_v21, %v1991_v52 }
 0x1a1   :  { %v2247_v24 = vadd.f32 %v1914_v21, %v1995_v40  ;;  %v2251_v32 = vadd.f32 %v1914_v21, %v1999_v46  ;;  %v2255_v55 = vadd.f32 %v1914_v21, %v2003_v5  ;;  %v2259_v23 = vadd.f32 %v1914_v21, %v2007_v19 }
 0x1a2   :  { %v2263_v45 = vadd.f32 %v1914_v21, %v2011_v11  ;;  %v2267_v52 = vadd.f32 %v1914_v21, %v2015_v63  ;;  %v2271_v40 = vadd.f32 %v1914_v21, %v2019_v2  ;;  %v2275_v46 = vadd.f32 %v1914_v21, %v2023_v49 }
 0x1a3   :  { %v2279_v5 = vadd.f32 %v1914_v21, %v2027_v9  ;;  %v2283_v19 = vadd.f32 %v1914_v21, %v2031_v53  ;;  %v2287_v11 = vadd.f32 %v1914_v21, %v2035_v62  ;;  %v2291_v63 = vadd.f32 %v1914_v21, %v2039_v29 }
 0x1a4   :  { %v2295_v2 = vadd.f32 %v1914_v21, %v2043_v10  ;;  %v2299_v49 = vadd.f32 %v1914_v21, %v2047_v42  ;;  %v2303_v9 = vadd.f32 %v1914_v21, %v2051_v50  ;;  %v2307_v53 = vadd.f32 %v1914_v21, %v2055_v57 }
 0x1a5   :  { %v2311_v62 = vadd.f32 %v1914_v21, %v2059_v8  ;;  %v2315_v29 = vadd.f32 %v1914_v21, %v2063_v15  ;;  %v2319_v10 = vadd.f32 %v1914_v21, %v2067_v6  ;;  %v2323_v42 = vadd.f32 %v1914_v21, %v2071_v13  ;;  %v2567_v13 = vld [vmem:[#allocation7_spill] sm:$0xff] }
 0x1a6   :  { %v2327_v50 = vadd.f32 %v1914_v21, %v2075_v28  ;;  %v2331_v57 = vadd.f32 %v1914_v21, %v2079_v35  ;;  %v2335_v8 = vadd.f32 %v1914_v21, %v2083_v26  ;;  %v2339_v15 = vadd.f32 %v1914_v21, %v2087_v33 }
 0x1a7   :  { %v2343_v6 = vadd.f32 %v1914_v21, %v2091_v60  ;;  %v2347_v28 = vadd.f32 %v1914_v21, %v2567_v13 }
 0x1a8   :  { %2562 = vst [vmem:[#allocation17_spill] sm:$0xff] %v2327_v50  ;;  %2563 = vst [vmem:[#allocation12_spill] sm:$0xff] %v2331_v57  ;;  %v2568_v50 = vld [vmem:[#allocation9_spill] sm:$0xff]  ;;  %v2569_v57 = vld [vmem:[#allocation11_spill] sm:$0xff] }
 0x1a9   :  { %2564 = vst [vmem:[#allocation15_spill] sm:$0xff] %v2335_v8  ;;  %2565 = vst [vmem:[#allocation21_spill] sm:$0xff] %v2339_v15  ;;  %v2351_v35 = vadd.f32 %v1914_v21, %v2568_v50  ;;  %v2355_v26 = vadd.f32 %v1914_v21, %v2569_v57  ;;  %v2570_v8 = vld [vmem:[#allocation8_spill] sm:$0xff]  ;;  %v2571_v15 = vld [vmem:[#allocation10_spill] sm:$0xff]  ;;  %v2371_v50 = vadd.f32 %v1914_v21, %v2119_v41 }
 0x1aa   :  { %2566 = vst [vmem:[#allocation25_spill] sm:$0xff] %v2343_v6  ;;  %v2359_v33 = vadd.f32 %v1914_v21, %v2570_v8  ;;  %v2363_v60 = vadd.f32 %v1914_v21, %v2571_v15  ;;  %v2572_v6 = vld [vmem:[#allocation14_spill] sm:$0xff]  ;;  %v2375_v57 = vadd.f32 %v1914_v21, %v2123_v16  ;;  %v2379_v8 = vadd.f32 %v1914_v21, %v2127_v47 }
 0x1ab   :  { %v2367_v13 = vadd.f32 %v1914_v21, %v2572_v6  ;;  %v2383_v15 = vadd.f32 %v1914_v21, %v2131_v20  ;;  %v2387_v6 = vadd.f32 %v1914_v21, %v2135_v59  ;;  %v2391_v41 = vadd.f32 %v1914_v21, %v2139_v3 }
 0x1ac   :  { %2573 = vst [vmem:[#allocation19_spill] sm:$0xff] %v2375_v57  ;;  %2574 = vst [vmem:[#allocation23_spill] sm:$0xff] %v2379_v8  ;;  %v2395_v16 = vadd.f32 %v1914_v21, %v2143_v54  ;;  %v1007_v57 = vmax.f32 %v2147_v1, 0.0  ;;  %v1008_v47 = vmax.f32 %v2151_v25, 0.0  ;;  %v1009_v8 = vmax.f32 %v2155_v43, 0.0 }
 0x1ad   :  { %2575 = vst [vmem:[#allocation5_spill] sm:$0xff] %v2383_v15  ;;  %2576 = vst [vmem:[#allocation6_spill] sm:$0xff] %v2387_v6  ;;  %v1010_v20 = vmax.f32 %v2159_v22, 0.0  ;;  %v1011_v15 = vmax.f32 %v2163_v0, 0.0  ;;  %v1012_v59 = vmax.f32 %v2167_v18, 0.0  ;;  %v1013_v6 = vmax.f32 %v2171_v31, 0.0 }
 0x1ae   :  { %2577 = vst [vmem:[#allocation18_spill] sm:$0xff] %v2391_v41  ;;  %v1014_v3 = vmax.f32 %v2175_v61, 0.0  ;;  %v1015_v41 = vmax.f32 %v2179_v44, 0.0  ;;  %1071 = vst [vmem:[#allocation2] sm:$0xff] %v1007_v57  ;;  %v1016_v21 = vmax.f32 %v2183_v30, 0.0  ;;  %v1017_v54 = vmax.f32 %v2187_v17, 0.0 }
 0x1af   :  { %v1018_v1 = vmax.f32 %v2191_v37, 0.0  ;;  %v1019_v25 = vmax.f32 %v2195_v39, 0.0  ;;  %1072 = vst [vmem:[#allocation2 + $0x8] sm:$0xff] %v1008_v47  ;;  %1073 = vst [vmem:[#allocation2 + $0x10] sm:$0xff] %v1009_v8  ;;  %v1020_v43 = vmax.f32 %v2199_v36, 0.0  ;;  %v1021_v22 = vmax.f32 %v2203_v38, 0.0 }
 0x1b0   :  { %1074 = vst [vmem:[#allocation2 + $0x18] sm:$0xff] %v1010_v20  ;;  %1075 = vst [vmem:[#allocation2 + $0x20] sm:$0xff] %v1011_v15  ;;  %v1022_v0 = vmax.f32 %v2207_v51, 0.0  ;;  %v1023_v18 = vmax.f32 %v2211_v58, 0.0  ;;  %v1024_v31 = vmax.f32 %v2215_v48, 0.0  ;;  %v1025_v61 = vmax.f32 %v2219_v56, 0.0 }
 0x1b1   :  { %1076 = vst [vmem:[#allocation2 + $0x28] sm:$0xff] %v1012_v59  ;;  %1077 = vst [vmem:[#allocation2 + $0x30] sm:$0xff] %v1013_v6  ;;  %v1026_v44 = vmax.f32 %v2223_v7, 0.0  ;;  %v1027_v30 = vmax.f32 %v2227_v14, 0.0  ;;  %v1028_v17 = vmax.f32 %v2231_v4, 0.0  ;;  %v1029_v37 = vmax.f32 %v2235_v12, 0.0 }
 0x1b2   :  { %1078 = vst [vmem:[#allocation2 + $0x38] sm:$0xff] %v1014_v3  ;;  %1079 = vst [vmem:[#allocation2 + $0x40] sm:$0xff] %v1015_v41  ;;  %v1030_v39 = vmax.f32 %v2239_v27, 0.0  ;;  %v1031_v36 = vmax.f32 %v2243_v34, 0.0  ;;  %v1032_v38 = vmax.f32 %v2247_v24, 0.0  ;;  %v1033_v51 = vmax.f32 %v2251_v32, 0.0 }
 0x1b3   :  { %1080 = vst [vmem:[#allocation2 + $0x48] sm:$0xff] %v1016_v21  ;;  %1081 = vst [vmem:[#allocation2 + $0x50] sm:$0xff] %v1017_v54  ;;  %v1034_v58 = vmax.f32 %v2255_v55, 0.0  ;;  %v1035_v48 = vmax.f32 %v2259_v23, 0.0  ;;  %v1036_v56 = vmax.f32 %v2263_v45, 0.0  ;;  %v1037_v7 = vmax.f32 %v2267_v52, 0.0 }
 0x1b4   :  { %1082 = vst [vmem:[#allocation2 + $0x58] sm:$0xff] %v1018_v1  ;;  %1083 = vst [vmem:[#allocation2 + $0x60] sm:$0xff] %v1019_v25  ;;  %v1038_v14 = vmax.f32 %v2271_v40, 0.0  ;;  %v1039_v4 = vmax.f32 %v2275_v46, 0.0  ;;  %v1040_v12 = vmax.f32 %v2279_v5, 0.0  ;;  %v1041_v27 = vmax.f32 %v2283_v19, 0.0 }
 0x1b5   :  { %1084 = vst [vmem:[#allocation2 + $0x68] sm:$0xff] %v1020_v43  ;;  %1085 = vst [vmem:[#allocation2 + $0x70] sm:$0xff] %v1021_v22  ;;  %v1042_v34 = vmax.f32 %v2287_v11, 0.0  ;;  %v1043_v24 = vmax.f32 %v2291_v63, 0.0  ;;  %v1044_v32 = vmax.f32 %v2295_v2, 0.0  ;;  %v1045_v55 = vmax.f32 %v2299_v49, 0.0 }
 0x1b6   :  { %1086 = vst [vmem:[#allocation2 + $0x78] sm:$0xff] %v1022_v0  ;;  %1087 = vst [vmem:[#allocation2 + $0x80] sm:$0xff] %v1023_v18  ;;  %v1046_v23 = vmax.f32 %v2303_v9, 0.0  ;;  %v1047_v45 = vmax.f32 %v2307_v53, 0.0  ;;  %v1048_v52 = vmax.f32 %v2311_v62, 0.0  ;;  %v1049_v40 = vmax.f32 %v2315_v29, 0.0 }
 0x1b7   :  { %1088 = vst [vmem:[#allocation2 + $0x88] sm:$0xff] %v1024_v31  ;;  %1089 = vst [vmem:[#allocation2 + $0x90] sm:$0xff] %v1025_v61  ;;  %v1050_v46 = vmax.f32 %v2319_v10, 0.0  ;;  %v1051_v5 = vmax.f32 %v2323_v42, 0.0  ;;  %v2578_v19 = vld [vmem:[#allocation17_spill] sm:$0xff]  ;;  %v2579_v63 = vld [vmem:[#allocation12_spill] sm:$0xff] }
 0x1b8   :  { %1090 = vst [vmem:[#allocation2 + $0x98] sm:$0xff] %v1026_v44  ;;  %1091 = vst [vmem:[#allocation2 + $0xa0] sm:$0xff] %v1027_v30  ;;  %v1052_v11 = vmax.f32 %v2578_v19, 0.0  ;;  %v1053_v2 = vmax.f32 %v2579_v63, 0.0  ;;  %v2580_v49 = vld [vmem:[#allocation15_spill] sm:$0xff]  ;;  %v2581_v53 = vld [vmem:[#allocation21_spill] sm:$0xff] }
 0x1b9   :  { %1092 = vst [vmem:[#allocation2 + $0xa8] sm:$0xff] %v1028_v17  ;;  %1093 = vst [vmem:[#allocation2 + $0xb0] sm:$0xff] %v1029_v37  ;;  %v1054_v9 = vmax.f32 %v2580_v49, 0.0  ;;  %v1055_v57 = vmax.f32 %v2581_v53, 0.0  ;;  %v2582_v62 = vld [vmem:[#allocation25_spill] sm:$0xff]  ;;  %v1057_v10 = vmax.f32 %v2347_v28, 0.0 }
 0x1ba   :  { %1094 = vst [vmem:[#allocation2 + $0xb8] sm:$0xff] %v1030_v39  ;;  %1095 = vst [vmem:[#allocation2 + $0xc0] sm:$0xff] %v1031_v36  ;;  %v1056_v29 = vmax.f32 %v2582_v62, 0.0  ;;  %v1058_v42 = vmax.f32 %v2351_v35, 0.0  ;;  %v1059_v8 = vmax.f32 %v2355_v26, 0.0  ;;  %v1060_v15 = vmax.f32 %v2359_v33, 0.0 }
 0x1bb   :  { %1096 = vst [vmem:[#allocation2 + $0xc8] sm:$0xff] %v1032_v38  ;;  %1097 = vst [vmem:[#allocation2 + $0xd0] sm:$0xff] %v1033_v51  ;;  %v1061_v6 = vmax.f32 %v2363_v60, 0.0  ;;  %v1062_v41 = vmax.f32 %v2367_v13, 0.0  ;;  %v1063_v47 = vmax.f32 %v2371_v50, 0.0  ;;  %v2583_v28 = vld [vmem:[#allocation19_spill] sm:$0xff] }
 0x1bc   :  { %1098 = vst [vmem:[#allocation2 + $0xd8] sm:$0xff] %v1034_v58  ;;  %1099 = vst [vmem:[#allocation2 + $0xe0] sm:$0xff] %v1035_v48  ;;  %v1064_v35 = vmax.f32 %v2583_v28, 0.0  ;;  %v2584_v20 = vld [vmem:[#allocation23_spill] sm:$0xff]  ;;  %v2585_v59 = vld [vmem:[#allocation5_spill] sm:$0xff]  ;;  %v1070_v13 = vmax.f32 %v2395_v16, 0.0 }
 0x1bd   :  { %1100 = vst [vmem:[#allocation2 + $0xe8] sm:$0xff] %v1036_v56  ;;  %1101 = vst [vmem:[#allocation2 + $0xf0] sm:$0xff] %v1037_v7  ;;  %v1065_v26 = vmax.f32 %v2584_v20, 0.0  ;;  %v1066_v3 = vmax.f32 %v2585_v59, 0.0  ;;  %v2586_v21 = vld [vmem:[#allocation6_spill] sm:$0xff] }
 0x1be   :  { %1102 = vst [vmem:[#allocation2 + $0xf8] sm:$0xff] %v1038_v14  ;;  %1103 = vst [vmem:[#allocation2 + $0x100] sm:$0xff] %v1039_v4  ;;  %v1067_v54 = vmax.f32 %v2586_v21, 0.0  ;;  %v2587_v33 = vld [vmem:[#allocation18_spill] sm:$0xff] }
 0x1bf   :  { %1104 = vst [vmem:[#allocation2 + $0x108] sm:$0xff] %v1040_v12  ;;  %1105 = vst [vmem:[#allocation2 + $0x110] sm:$0xff] %v1041_v27  ;;  %v1069_v60 = vmax.f32 %v2587_v33, 0.0 }
 0x1c0   :  { %1106 = vst [vmem:[#allocation2 + $0x118] sm:$0xff] %v1042_v34  ;;  %1107 = vst [vmem:[#allocation2 + $0x120] sm:$0xff] %v1043_v24 }
 0x1c1   :  { %1108 = vst [vmem:[#allocation2 + $0x128] sm:$0xff] %v1044_v32  ;;  %1109 = vst [vmem:[#allocation2 + $0x130] sm:$0xff] %v1045_v55 }
 0x1c2   :  { %1110 = vst [vmem:[#allocation2 + $0x138] sm:$0xff] %v1046_v23  ;;  %1111 = vst [vmem:[#allocation2 + $0x140] sm:$0xff] %v1047_v45 }
 0x1c3   :  { %1112 = vst [vmem:[#allocation2 + $0x148] sm:$0xff] %v1048_v52  ;;  %1113 = vst [vmem:[#allocation2 + $0x150] sm:$0xff] %v1049_v40 }
 0x1c4   :  { %1114 = vst [vmem:[#allocation2 + $0x158] sm:$0xff] %v1050_v46  ;;  %1115 = vst [vmem:[#allocation2 + $0x160] sm:$0xff] %v1051_v5 }
 0x1c5   :  { %1116 = vst [vmem:[#allocation2 + $0x168] sm:$0xff] %v1052_v11  ;;  %1117 = vst [vmem:[#allocation2 + $0x170] sm:$0xff] %v1053_v2 }
 0x1c6   :  { %1118 = vst [vmem:[#allocation2 + $0x178] sm:$0xff] %v1054_v9  ;;  %1119 = vst [vmem:[#allocation2 + $0x180] sm:$0xff] %v1055_v57 }
 0x1c7   :  { %1120 = vst [vmem:[#allocation2 + $0x188] sm:$0xff] %v1056_v29  ;;  %1121 = vst [vmem:[#allocation2 + $0x190] sm:$0xff] %v1057_v10 }
 0x1c8   :  { %1122 = vst [vmem:[#allocation2 + $0x198] sm:$0xff] %v1058_v42  ;;  %1123 = vst [vmem:[#allocation2 + $0x1a0] sm:$0xff] %v1059_v8 }
 0x1c9   :  { %1124 = vst [vmem:[#allocation2 + $0x1a8] sm:$0xff] %v1060_v15  ;;  %1125 = vst [vmem:[#allocation2 + $0x1b0] sm:$0xff] %v1061_v6 }
 0x1ca   :  { %1126 = vst [vmem:[#allocation2 + $0x1b8] sm:$0xff] %v1062_v41  ;;  %1127 = vst [vmem:[#allocation2 + $0x1c0] sm:$0xff] %v1063_v47 }
 0x1cb   :  { %1128 = vst [vmem:[#allocation2 + $0x1c8] sm:$0xff] %v1064_v35  ;;  %1129 = vst [vmem:[#allocation2 + $0x1d0] sm:$0xff] %v1065_v26 }
 0x1cc   :  { %1130 = vst [vmem:[#allocation2 + $0x1d8] sm:$0xff] %v1066_v3  ;;  %1131 = vst [vmem:[#allocation2 + $0x1e0] sm:$0xff] %v1067_v54 }
 0x1cd   :  { %1133 = vst [vmem:[#allocation2 + $0x1f0] sm:$0xff] %v1069_v60  ;;  %1134 = vst [vmem:[#allocation2 + $0x1f8] sm:$0xff] %v1070_v13 }
 0x1ce   :  { %1382 = shalt.err (!%p1379_p4)
}
 0x1cf   :  { %s1383_s10 = scalar_lea.hbm %s2483_s4, 8192 }
 0x1d0   :  { %p1384_p5 = scmp.ne.s32.totalorder %s2483_s4, %s1383_s10  ;;  %p1387_p6 = scmp.lt.u32.totalorder %s1383_s10, %s2483_s4 }
 0x1d2   :  { %p1389_p7 = pnand %p1387_p6, %p1384_p5 }
 0x1d4   :  { %1392 = shalt.err (!%p1389_p7)
}
 0x1d5   :  { %s1396_s15 = smov 128   ;;  %s1397_s16 = smov 8  }
 0x1d6   :  { %1146 = dma.vmem_to_hbm [thread:$0]  %s2458_s3, 8192, %s2483_s4, [#allocation3], %s1396_s15, %s1396_s15, %s1397_s16  }
 0x1d7   :  { %1393 = dma.done.wait [#allocation3], 8192  }
 0x1d8   :  { %1394 = vsyncadd [#allocation3], 4294959104 }
 0x1d9   :  { %1150 = vsyncpa [#allocation3], 1 }

</bundles_post_ra>
